<compile_context>
chip_gen: v7x
topology: tpu7x:2x2x1
jax: 0.10.0
libtpu: 0.0.40
codegen_flags: <defaults>
</compile_context>

<pallas_src>
import jax
import jax.numpy as jnp
from jax import lax
from jax.experimental import pallas as pl
from jax.experimental.pallas import tpu as pltpu


def _critic_state_kernel(x_ref, w1_ref, b1_ref, w2_ref, b2_ref,
                         w3_ref, b3_ref, w4_ref, b4_ref, out_ref):
    """Fused 4-layer MLP; activations kept as (features, batch_tile).

    x_ref:  (block_b, dim_state) float32 (natural layout; cast in-kernel)
    w{1,2,3}_ref: (out, in)      compute dtype (MXU operands, VMEM-resident)
    b{1,2,3}_ref: (out, 1)       float32
    w4_ref: (fc3, 1), b4_ref: (1, 1)  float32 (VPU/XLU head)
    out_ref: (1, block_b)        float32, lane-dense
    """
    # Layer 1: contract the feature axis of both operands so the batch lands on
    # the lane axis of the result: (fc1, block_b).  Cast to the MXU dtype here,
    # not in the wrapper.
    x = x_ref[...].astype(w1_ref.dtype)
    h = lax.dot_general(w1_ref[...], x,
                        dimension_numbers=(((1,), (1,)), ((), ())),
                        preferred_element_type=jnp.float32)
    h = jnp.maximum(h + b1_ref[...], 0.0)                       # (fc1, bb) f32

    h = jnp.dot(w2_ref[...], h.astype(w2_ref.dtype),
                preferred_element_type=jnp.float32)
    h = jnp.maximum(h + b2_ref[...], 0.0)                       # (fc2, bb) f32

    h = jnp.dot(w3_ref[...], h.astype(w3_ref.dtype),
                preferred_element_type=jnp.float32)
    h = jnp.maximum(h + b3_ref[...], 0.0)                       # (fc3, bb) f32

    # Head (fc3 -> 1): VPU multiply + sublane reduction (XLU slot), not a
    # degenerate 1-row MXU matmul.  Result is lane-dense (1, block_b).
    z = jnp.sum(w4_ref[...] * h, axis=0, keepdims=True) + b4_ref[...]
    out_ref[...] = z.astype(out_ref.dtype)


def _round_up(x, m):
    return ((x + m - 1) // m) * m


def reference_forward(state, params):
    """Pure-JAX reference matching the PyTorch module (f32-accurate matmuls)."""
    (w1, b1), (w2, b2), (w3, b3), (w4, b4) = params
    hp = "highest"
    h = jnp.maximum(jnp.matmul(state, w1.T, precision=hp) + b1, 0.0)
    h = jnp.maximum(jnp.matmul(h, w2.T, precision=hp) + b2, 0.0)
    h = jnp.maximum(jnp.matmul(h, w3.T, precision=hp) + b3, 0.0)
    return jnp.matmul(h, w4.T, precision=hp) + b4


def critic_state_forward(state, params, *, block_b=1024,
                         compute_dtype=jnp.bfloat16,
                         small_batch_threshold=128):
    """Run the fused critic MLP.

    state:  [B, dim_state] float32
    params: ((w1,b1),(w2,b2),(w3,b3),(w4,b4)) in PyTorch layout (W: [out,in]).
    Returns [B, 1] float32.
    """
    (w1, b1), (w2, b2), (w3, b3), (w4, b4) = params
    B, dim_state = state.shape
    fc1, fc2, fc3 = w1.shape[0], w2.shape[0], w3.shape[0]

    # Small-batch fast path: one grid step would be dominated by launch
    # overhead; a single XLA fusion is faster on every TPU generation.
    if B < small_batch_threshold:
        return reference_forward(state.astype(jnp.float32), params)

    assert block_b % 128 == 0, "block_b must be a multiple of 128 (lane width)"
    # >= 2 grid steps for mid-size batches (v7x megacore), capped at block_b;
    # large batches amortize the fixed per-step (~0.35 us) cost.
    bb = min(block_b, max(128, _round_up(pl.cdiv(B, 2), 128)))
    num_blocks = pl.cdiv(B, bb)   # partial last tile handled by Pallas masking

    state = state.astype(jnp.float32)
    # Tiny (<=16 KB) MXU operands cast once at the boundary; bias/head math f32.
    w1c = w1.astype(compute_dtype)
    w2c = w2.astype(compute_dtype)
    w3c = w3.astype(compute_dtype)
    b1c = b1.reshape(fc1, 1).astype(jnp.float32)
    b2c = b2.reshape(fc2, 1).astype(jnp.float32)
    b3c = b3.reshape(fc3, 1).astype(jnp.float32)
    w4c = w4.reshape(fc3, 1).astype(jnp.float32)   # head column (VPU path)
    b4c = b4.reshape(1, 1).astype(jnp.float32)

    def const_spec(shape):
        # Grid-invariant operand: full-array block + constant index_map
        # -> stays resident in VMEM, no re-DMA across grid steps.
        return pl.BlockSpec(shape, lambda i: (0, 0))

    flops = int(2 * B * (dim_state * fc1 + fc1 * fc2 + fc2 * fc3 + fc3))
    bytes_accessed = int(
        state.size * 4 + B * 4
        + sum(int(a.size) * a.dtype.itemsize
              for a in (w1c, b1c, w2c, b2c, w3c, b3c, w4c, b4c)))

    out_t = pl.pallas_call(
        _critic_state_kernel,
        out_shape=jax.ShapeDtypeStruct((1, B), jnp.float32),
        grid_spec=pltpu.PrefetchScalarGridSpec(
            num_scalar_prefetch=0,
            grid=(num_blocks,),
            in_specs=[
                # State tiled on the batch axis in its natural layout — no
                # wrapper transpose/pad/cast, single HBM read inside the kernel.
                pl.BlockSpec((bb, dim_state), lambda i: (i, 0)),
                const_spec((fc1, dim_state)), const_spec((fc1, 1)),
                const_spec((fc2, fc1)),       const_spec((fc2, 1)),
                const_spec((fc3, fc2)),       const_spec((fc3, 1)),
                const_spec((fc3, 1)),         const_spec((1, 1)),
            ],
            # Lane-dense output tile: full-lane vst's, no 1-wide masked stores.
            out_specs=pl.BlockSpec((1, bb), lambda i: (0, i)),
        ),
        compiler_params=pltpu.CompilerParams(
            dimension_semantics=("parallel",)),
        cost_estimate=pl.CostEstimate(
            flops=flops, transcendentals=0, bytes_accessed=bytes_accessed),
    )(state, w1c, b1c, w2c, b2c, w3c, b3c, w4c, b4c)

    # (1, B) -> [B, 1]: pure row-major relabel, no data movement.
    return out_t.reshape(B, 1)


def init_linear(key, fan_in, fan_out):
    """PyTorch nn.Linear-style init: W ~ U[-1/sqrt(fan_in), ...], shape [out, in]."""
    kw, kb = jax.random.split(key)
    bound = 1.0 / jnp.sqrt(jnp.float32(fan_in))
    w = jax.random.uniform(kw, (fan_out, fan_in), jnp.float32, -bound, bound)
    b = jax.random.uniform(kb, (fan_out,), jnp.float32, -bound, bound)
    return w, b


# TODO(synk): optimizer (Adam + weight decay) and .to(device) are training /
# runtime plumbing, not part of the forward pass; not implemented in Pallas.

if __name__ == "__main__":
    # Shapes consistent with the module (centralized critic over concatenated
    # agent observations).
    dim_state = 32
    fc1, fc2, fc3 = 64, 64, 32

    key = jax.random.PRNGKey(0)
    k_x, k1, k2, k3, k4 = jax.random.split(key, 5)

    params = (
        init_linear(k1, dim_state, fc1),
        init_linear(k2, fc1, fc2),
        init_linear(k3, fc2, fc3),
        init_linear(k4, fc3, 1),
    )

    # --- Pallas path, B >= 128: two parallel grid steps (bb = 128).
    B = 256
    state = jax.random.normal(k_x, (B, dim_state), jnp.float32)
    z_ref = reference_forward(state, params)

    # Float32 MXU path: tight check vs highest-precision reference.
    z_f32 = jax.block_until_ready(
        critic_state_forward(state, params, compute_dtype=jnp.float32))
    assert z_f32.shape == (B, 1)
    assert jnp.allclose(z_f32, z_ref, atol=1e-3, rtol=1e-3), "f32 mismatch"

    # bf16-MXU path (recommended on v6e/v7x): looser tolerance.
    z_bf16 = jax.block_until_ready(
        critic_state_forward(state, params, compute_dtype=jnp.bfloat16))
    assert z_bf16.shape == (B, 1)
    assert jnp.allclose(z_bf16, z_ref, atol=1e-1, rtol=5e-2), "bf16 mismatch"

    # --- Non-multiple batch: partial last tile (masked input read / output write).
    B2 = 1000
    state2 = jax.random.normal(jax.random.PRNGKey(1), (B2, dim_state), jnp.float32)
    z2 = jax.block_until_ready(
        critic_state_forward(state2, params, compute_dtype=jnp.float32))
    z2_ref = reference_forward(state2, params)
    assert z2.shape == (B2, 1)
    assert jnp.allclose(z2, z2_ref, atol=1e-3, rtol=1e-3), "tiled f32 mismatch"

    # --- Small-batch fast path (B < 128): single XLA fusion, no pallas_call.
    B3 = 8
    state3 = jax.random.normal(jax.random.PRNGKey(2), (B3, dim_state), jnp.float32)
    z3 = jax.block_until_ready(critic_state_forward(state3, params))
    z3_ref = reference_forward(state3, params)
    assert z3.shape == (B3, 1)
    assert jnp.allclose(z3, z3_ref, atol=1e-3, rtol=1e-3), "fast-path mismatch"

    print("KERNEL_OK")
</pallas_src>

<mosaic_0001>
module attributes {stable_mosaic.version = 11 : i64} {
  func.func @_critic_state_kernel(%arg0: i32, %arg1: memref<128x32xf32, #tpu.memory_space<vmem>>, %arg2: memref<64x32xf32, #tpu.memory_space<vmem>>, %arg3: memref<64x1xf32, #tpu.memory_space<vmem>>, %arg4: memref<64x64xf32, #tpu.memory_space<vmem>>, %arg5: memref<64x1xf32, #tpu.memory_space<vmem>>, %arg6: memref<32x64xf32, #tpu.memory_space<vmem>>, %arg7: memref<32x1xf32, #tpu.memory_space<vmem>>, %arg8: memref<32x1xf32, #tpu.memory_space<vmem>>, %arg9: memref<1x1xf32, #tpu.memory_space<vmem>>, %arg10: memref<1x128xf32, #tpu.memory_space<vmem>>) attributes {dimension_semantics = [#tpu.dimension_semantics<parallel>], iteration_bounds = array<i64: 2>, scalar_prefetch = 0 : i64, scratch_operands = 0 : i64, tpu.core_type = #tpu.core_type<tc>, window_params = [{transform_indices = @transform_0, window_bounds = array<i64: 128, 32>}, {pipeline_mode = #tpu.pipeline_mode<synchronous>, transform_indices = @transform_1, window_bounds = array<i64: 64, 32>}, {pipeline_mode = #tpu.pipeline_mode<synchronous>, transform_indices = @transform_2, window_bounds = array<i64: 64, 1>}, {pipeline_mode = #tpu.pipeline_mode<synchronous>, transform_indices = @transform_3, window_bounds = array<i64: 64, 64>}, {pipeline_mode = #tpu.pipeline_mode<synchronous>, transform_indices = @transform_4, window_bounds = array<i64: 64, 1>}, {pipeline_mode = #tpu.pipeline_mode<synchronous>, transform_indices = @transform_5, window_bounds = array<i64: 32, 64>}, {pipeline_mode = #tpu.pipeline_mode<synchronous>, transform_indices = @transform_6, window_bounds = array<i64: 32, 1>}, {pipeline_mode = #tpu.pipeline_mode<synchronous>, transform_indices = @transform_7, window_bounds = array<i64: 32, 1>}, {pipeline_mode = #tpu.pipeline_mode<synchronous>, transform_indices = @transform_8, window_bounds = array<i64: 1, 1>}, {transform_indices = @transform_9, window_bounds = array<i64: 1, 128>}]} {
    %c0 = arith.constant 0 : index
    %c0_0 = arith.constant 0 : index
    %0 = vector.load %arg1[%c0, %c0_0] : memref<128x32xf32, #tpu.memory_space<vmem>>, vector<128x32xf32>
    %c0_1 = arith.constant 0 : index
    %c0_2 = arith.constant 0 : index
    %1 = vector.load %arg2[%c0_1, %c0_2] : memref<64x32xf32, #tpu.memory_space<vmem>>, vector<64x32xf32>
    %cst = arith.constant dense<0.000000e+00> : vector<64x128xf32>
    %2 = tpu.matmul %1, %0, %cst {dimension_numbers = #tpu.dot_dimension_numbers<[1], [1], [0], [0], [0, 0, 1, 0], [], []>} : vector<64x32xf32>, vector<128x32xf32>, vector<64x128xf32> -> vector<64x128xf32>
    %c0_3 = arith.constant 0 : index
    %c0_4 = arith.constant 0 : index
    %3 = vector.load %arg3[%c0_3, %c0_4] : memref<64x1xf32, #tpu.memory_space<vmem>>, vector<64x1xf32>
    %4 = vector.broadcast %3 : vector<64x1xf32> to vector<64x128xf32>
    %5 = arith.addf %2, %4 : vector<64x128xf32>
    %cst_5 = arith.constant 0.000000e+00 : f32
    %6 = vector.broadcast %cst_5 : f32 to vector<64x128xf32>
    %7 = arith.maximumf %5, %6 : vector<64x128xf32>
    %c0_6 = arith.constant 0 : index
    %c0_7 = arith.constant 0 : index
    %8 = vector.load %arg4[%c0_6, %c0_7] : memref<64x64xf32, #tpu.memory_space<vmem>>, vector<64x64xf32>
    %cst_8 = arith.constant dense<0.000000e+00> : vector<64x128xf32>
    %9 = tpu.matmul %8, %7, %cst_8 {dimension_numbers = #tpu.dot_dimension_numbers<[1], [0], [0], [1], [0, 0, 1, 1], [], []>} : vector<64x64xf32>, vector<64x128xf32>, vector<64x128xf32> -> vector<64x128xf32>
    %c0_9 = arith.constant 0 : index
    %c0_10 = arith.constant 0 : index
    %10 = vector.load %arg5[%c0_9, %c0_10] : memref<64x1xf32, #tpu.memory_space<vmem>>, vector<64x1xf32>
    %11 = vector.broadcast %10 : vector<64x1xf32> to vector<64x128xf32>
    %12 = arith.addf %9, %11 : vector<64x128xf32>
    %cst_11 = arith.constant 0.000000e+00 : f32
    %13 = vector.broadcast %cst_11 : f32 to vector<64x128xf32>
    %14 = arith.maximumf %12, %13 : vector<64x128xf32>
    %c0_12 = arith.constant 0 : index
    %c0_13 = arith.constant 0 : index
    %15 = vector.load %arg6[%c0_12, %c0_13] : memref<32x64xf32, #tpu.memory_space<vmem>>, vector<32x64xf32>
    %cst_14 = arith.constant dense<0.000000e+00> : vector<32x128xf32>
    %16 = tpu.matmul %15, %14, %cst_14 {dimension_numbers = #tpu.dot_dimension_numbers<[1], [0], [0], [1], [0, 0, 1, 1], [], []>} : vector<32x64xf32>, vector<64x128xf32>, vector<32x128xf32> -> vector<32x128xf32>
    %c0_15 = arith.constant 0 : index
    %c0_16 = arith.constant 0 : index
    %17 = vector.load %arg7[%c0_15, %c0_16] : memref<32x1xf32, #tpu.memory_space<vmem>>, vector<32x1xf32>
    %18 = vector.broadcast %17 : vector<32x1xf32> to vector<32x128xf32>
    %19 = arith.addf %16, %18 : vector<32x128xf32>
    %cst_17 = arith.constant 0.000000e+00 : f32
    %20 = vector.broadcast %cst_17 : f32 to vector<32x128xf32>
    %21 = arith.maximumf %19, %20 : vector<32x128xf32>
    %c0_18 = arith.constant 0 : index
    %c0_19 = arith.constant 0 : index
    %22 = vector.load %arg8[%c0_18, %c0_19] : memref<32x1xf32, #tpu.memory_space<vmem>>, vector<32x1xf32>
    %23 = vector.broadcast %22 : vector<32x1xf32> to vector<32x128xf32>
    %24 = arith.mulf %23, %21 : vector<32x128xf32>
    %cst_20 = arith.constant dense<0.000000e+00> : vector<128xf32>
    %25 = vector.multi_reduction <add>, %24, %cst_20 [0] : vector<32x128xf32> to vector<128xf32>
    %26 = vector.shape_cast %25 : vector<128xf32> to vector<1x128xf32>
    %c0_21 = arith.constant 0 : index
    %c0_22 = arith.constant 0 : index
    %27 = vector.load %arg9[%c0_21, %c0_22] : memref<1x1xf32, #tpu.memory_space<vmem>>, vector<1x1xf32>
    %28 = vector.broadcast %27 : vector<1x1xf32> to vector<1x128xf32>
    %29 = arith.addf %26, %28 : vector<1x128xf32>
    %c0_23 = arith.constant 0 : index
    %c0_24 = arith.constant 0 : index
    %30 = vector.load %arg10[%c0_23, %c0_24] : memref<1x128xf32, #tpu.memory_space<vmem>>, vector<1x128xf32>
    tpu.vector_store %arg10[%c0_23, %c0_24], %29 {strides = array<i32>} : memref<1x128xf32, #tpu.memory_space<vmem>>, vector<1x128xf32>,
    return
  }
  func.func @transform_0(%arg0: i32) -> (i32, i32) {
    %c0_i32 = arith.constant 0 : i32
    %c0_i32_0 = arith.constant 0 : i32
    return %arg0, %c0_i32 : i32, i32
  }
  func.func @transform_1(%arg0: i32) -> (i32, i32) {
    %c0_i32 = arith.constant 0 : i32
    %c0_i32_0 = arith.constant 0 : i32
    %c0_i32_1 = arith.constant 0 : i32
    return %c0_i32, %c0_i32_0 : i32, i32
  }
  func.func @transform_2(%arg0: i32) -> (i32, i32) {
    %c0_i32 = arith.constant 0 : i32
    %c0_i32_0 = arith.constant 0 : i32
    %c0_i32_1 = arith.constant 0 : i32
    return %c0_i32, %c0_i32_0 : i32, i32
  }
  func.func @transform_3(%arg0: i32) -> (i32, i32) {
    %c0_i32 = arith.constant 0 : i32
    %c0_i32_0 = arith.constant 0 : i32
    %c0_i32_1 = arith.constant 0 : i32
    return %c0_i32, %c0_i32_0 : i32, i32
  }
  func.func @transform_4(%arg0: i32) -> (i32, i32) {
    %c0_i32 = arith.constant 0 : i32
    %c0_i32_0 = arith.constant 0 : i32
    %c0_i32_1 = arith.constant 0 : i32
    return %c0_i32, %c0_i32_0 : i32, i32
  }
  func.func @transform_5(%arg0: i32) -> (i32, i32) {
    %c0_i32 = arith.constant 0 : i32
    %c0_i32_0 = arith.constant 0 : i32
    %c0_i32_1 = arith.constant 0 : i32
    return %c0_i32, %c0_i32_0 : i32, i32
  }
  func.func @transform_6(%arg0: i32) -> (i32, i32) {
    %c0_i32 = arith.constant 0 : i32
    %c0_i32_0 = arith.constant 0 : i32
    %c0_i32_1 = arith.constant 0 : i32
    return %c0_i32, %c0_i32_0 : i32, i32
  }
  func.func @transform_7(%arg0: i32) -> (i32, i32) {
    %c0_i32 = arith.constant 0 : i32
    %c0_i32_0 = arith.constant 0 : i32
    %c0_i32_1 = arith.constant 0 : i32
    return %c0_i32, %c0_i32_0 : i32, i32
  }
  func.func @transform_8(%arg0: i32) -> (i32, i32) {
    %c0_i32 = arith.constant 0 : i32
    %c0_i32_0 = arith.constant 0 : i32
    %c0_i32_1 = arith.constant 0 : i32
    return %c0_i32, %c0_i32_0 : i32, i32
  }
  func.func @transform_9(%arg0: i32) -> (i32, i32) {
    %c0_i32 = arith.constant 0 : i32
    %c0_i32_0 = arith.constant 0 : i32
    return %c0_i32, %arg0 : i32, i32
  }
}

</mosaic_0001>

<bundles_post_ra>
// kernel: tpu_custom_call.1
= control target key start
LH: loop header
LB: loop body
LE: loop exit
PB: predicated region body
PF: predicated region fallthrough
CT: control target
= control target key end

     0   :  { %s1771_s0 = inlined_call_operand.vmem [shape: f32[256,32], index: 0, kind: input, shape index: {}]   ;;  %s1772_s1 = inlined_call_operand.vmem [shape: f32[64,32], index: 1, kind: input, shape index: {}]   ;;  %s1773_s2 = inlined_call_operand.vmem [shape: f32[64,1], index: 2, kind: input, shape index: {}]   ;;  %s1774_s3 = inlined_call_operand.vmem [shape: f32[64,64], index: 3, kind: input, shape index: {}]   ;;  %s1775_s4 = inlined_call_operand.vmem [shape: f32[64,1], index: 4, kind: input, shape index: {}]   ;;  %s1776_s5 = inlined_call_operand.vmem [shape: f32[32,64], index: 5, kind: input, shape index: {}]   ;;  %s1777_s6 = inlined_call_operand.vmem [shape: f32[32,1], index: 6, kind: input, shape index: {}]   ;;  %s1778_s7 = inlined_call_operand.vmem [shape: f32[32,1], index: 7, kind: input, shape index: {}]   ;;  %s1779_s8 = inlined_call_operand.<no memory space> [shape: f32[1,1], index: 8, kind: input, shape index: {}]   ;;  %s1780_s9 = inlined_call_operand.hbm [shape: f32[1,256], index: 9, kind: output, shape index: {}]  }
   0x1   :  { %v14_v0 = vstv %s1779_s8 }
   0x2   :  { %15 = vst [vmem:[#allocation2] sm:$0x1] %v14_v0 }
   0x3   :  { %16 = vsyncpa [#allocation4], 0 }
   0x4   :  { %18 = vsyncpa [#allocation4 + $0x1], 0  ;;  %s1464_s11 = smov 0   ;;  %s1466_s12 = smov 0  }
   0x5   :  { %s1468_s13 = smov 0   ;;  %s1470_s14 = smov 0  }
   0x6 LB: > { %s1031_s8 = sadd.s32 4294967295, %s1407_s14   ;;  %s1032_s15 = sadd.s32 4294967294, %s1407_s14   ;;  %s1407_s14 = sphi %s1470_s14, %s1788_s14   ;;  %s1403_s13 = sphi %s1468_s13, %s1787_s13   ;;  %s1399_s12 = sphi %s1466_s12, %s1786_s12   ;;  %s1395_s11 = sphi %s1464_s11, %s1785_s11  }
   0x7   : > { %s1487_s16 = sadd.s32 1, %s1407_s14   ;;  %s225_s17 = sadd.s32 1, %s1403_s13 }
   0x8   : > { %s222_s18 = ssub.s32 %s1407_s14, %s1487_s16  ;;  %p235_p0 = scmp.ne.s32.totalorder %s1403_s13, %s1399_s12 }
   0x9   : > { %p223_p1 = scmp.eq.s32.totalorder %s222_s18, 0  ;;  %p236_p2 = scmp.eq.s32.totalorder %s1031_s8, 1 }
   0xa   : > { %p241_p3 = scmp.ne.s32.totalorder %s1399_s12, %s1395_s11  ;;  %p242_p4 = scmp.eq.s32.totalorder %s1032_s15, 1 }
   0xb   : > { %s1497_s19 = scalar_select %p223_p1, %s1403_s13, %s225_s17  }
   0xc   : > { %p1499_p5 = por %p236_p2, %p235_p0  ;;  %p1503_p6 = por %p242_p4, %p241_p3 }
   0xd   : > { %p1035_p7 = scmp.ge.s32.totalorder %s1407_s14, 1  ;;  %p293_p8 = scmp.lt.s32.totalorder %s1407_s14, 3 }
   0xf   : > { %p294_p9 = pnand %p1035_p7, %p293_p8 }
  0x10   : > { %s1509_s22 = sshll.u32 (!%p294_p9), %s1031_s8, 4  ;;  %vm406_vm0 = vcmask (!%p294_p9), 261120   ;;  %v350_v1 = vld [vmem:[%s1772_s1] sm:$0xff] (!%p294_p9)  ;;  %v1409_v2 = vmov (!%p294_p9), 0   ;;  %v360_v4 = vld [vmem:[%s1773_s2 + $0x10] sm:$0xff] (!%p294_p9)  ;;  %v359_v5 = vld [vmem:[%s1773_s2 + $0x8] sm:$0xff] (!%p294_p9) }
  0x11   : > { %297 = sbr.rel (%p294_p9) target bundleno = 820 (0x334), region = 56  ;;  %p329_p10 = scmp.lt.s32.totalorder (!%p294_p9), %s1509_s22, 31  ;;  %1161 = vmatprep.mubr.msk.f32.mxu0 (!%p294_p9), %vm406_vm0, %v350_v1  ;;  %1343 = vset.pattern.permute.xlu0 (!%p294_p9), %v1409_v2  ;;  %v358_v3 = vld [vmem:[%s1773_s2] sm:$0xff] (!%p294_p9)  ;;  %v361_v6 = vld [vmem:[%s1773_s2 + $0x18] sm:$0xff] (!%p294_p9)  ;;  %vm1536_vm1 = vmpackc.low (!%p294_p9), %vm406_vm0, %vm406_vm0  ;;  %vm648_vm2 = vcmask (!%p294_p9), 523264  }
  0x12   : > { %1344 = vset.pattern.permute.xlu1 (!%p294_p9), %v1409_v2  ;;  %368 = vperm.xlu0 (!%p294_p9), %1343, %v358_v3   ;;  %v362_v14 = vld [vmem:[%s1773_s2 + $0x20] sm:$0xff] (!%p294_p9)  ;;  %v363_v15 = vld [vmem:[%s1773_s2 + $0x28] sm:$0xff] (!%p294_p9)  ;;  %v364_v18 = vld [vmem:[%s1773_s2 + $0x30] sm:$0xff] (!%p294_p9)  ;;  %s326_s28 = sand.u32 (!%p294_p9), 1, %s1399_s12   ;;  %s1410_s18 = smov (!%p294_p9), [#allocation3]  }
  0x13   : > { %378 = vperm.xlu1 (!%p294_p9), %1344, %v360_v4   ;;  %v365_v19 = vld [vmem:[%s1773_s2 + $0x38] sm:$0xff] (!%p294_p9)  ;;  %v600_v21 = vld [vmem:[%s1775_s4] sm:$0xff] (!%p294_p9)  ;;  %v601_v22 = vld [vmem:[%s1775_s4 + $0x8] sm:$0xff] (!%p294_p9)  ;;  %s327_s29 = scalar_lea.vmem (!%p294_p9), [#allocation3], %s326_s28  ;;  %s965_s15 = scalar_lea.sflag (!%p294_p9), [#allocation4], %s326_s28 }
  0x14   : > { %v602_v25 = vld [vmem:[%s1775_s4 + $0x10] sm:$0xff] (!%p294_p9)  ;;  %v603_v26 = vld [vmem:[%s1775_s4 + $0x18] sm:$0xff] (!%p294_p9)  ;;  %v604_v28 = vld [vmem:[%s1775_s4 + $0x20] sm:$0xff] (!%p294_p9)  ;;  %s1349_s23 = sshll.u32 (!%p294_p9), %s1410_s18, 4  ;;  %s1350_s23 = int_to_ptr.vmem [resolvable:$false] %s1349_s23 }
  0x15   : > { %v605_v29 = vld [vmem:[%s1775_s4 + $0x28] sm:$0xff] (!%p294_p9)  ;;  %v606_v32 = vld [vmem:[%s1775_s4 + $0x30] sm:$0xff] (!%p294_p9)  ;;  %v607_v33 = vld [vmem:[%s1775_s4 + $0x38] sm:$0xff] (!%p294_p9) }
  0x16   : > { %373 = vperm.xlu0 (!%p294_p9), %1343, %v359_v5   ;;  %v790_v35 = vld [vmem:[%s1777_s6] sm:$0xff] (!%p294_p9)  ;;  %v791_v36 = vld [vmem:[%s1777_s6 + $0x8] sm:$0xff] (!%p294_p9)  ;;  %v792_v39 = vld [vmem:[%s1777_s6 + $0x10] sm:$0xff] (!%p294_p9) }
  0x17   : > { %383 = vperm.xlu1 (!%p294_p9), %1344, %v361_v6   ;;  %v793_v40 = vld [vmem:[%s1777_s6 + $0x18] sm:$0xff] (!%p294_p9)  ;;  %v915_v42 = vld [vmem:[%s1778_s7] sm:$0xff] (!%p294_p9)  ;;  %v916_v43 = vld [vmem:[%s1778_s7 + $0x8] sm:$0xff] (!%p294_p9) }
  0x18   : > { %s330_s25 = scalar_select %p329_p10, %s1509_s22, 31  ;;  %v917_v46 = vld [vmem:[%s1778_s7 + $0x10] sm:$0xff]  ;;  %v918_v47 = vld [vmem:[%s1778_s7 + $0x18] sm:$0xff]  ;;  %v952_v49 = vld [vmem:[#allocation2] sm:$0x1] }
  0x19   : > { %v351_v53 = vld [vmem:[%s1772_s1 + $0x8] sm:$0xff]  ;;  %v352_v54 = vld [vmem:[%s1772_s1 + $0x10] sm:$0xff]  ;;  %v353_v55 = vld [vmem:[%s1772_s1 + $0x18] sm:$0xff] }
  0x1a   : > { %s1037_s30 = sshll.u32 %s330_s25, 3  ;;  %388 = vperm.xlu0 %1343, %v362_v14   ;;  %v354_v56 = vld [vmem:[%s1772_s1 + $0x20] sm:$0xff]  ;;  %v355_v57 = vld [vmem:[%s1772_s1 + $0x28] sm:$0xff]  ;;  %v356_v58 = vld [vmem:[%s1772_s1 + $0x30] sm:$0xff]  ;;  %s1351_s25 = scalar_lea.vmem %s1350_s23, 32 }
  0x1b   : > { %s1532_s24 = scalar_lea.vmem %s1771_s0, %s1037_s30  ;;  %393 = vperm.xlu1 %1344, %v363_v15   ;;  %v357_v59 = vld [vmem:[%s1772_s1 + $0x38] sm:$0xff]  ;;  %v592_v60 = vld [vmem:[%s1774_s3] sm:$0xff]  ;;  %s977_s30 = sshll.u32 %s327_s29, 4  ;;  %s1731_s30 = int_to_ptr.vmem [resolvable:$true] %s977_s30 }
  0x1c   : > { %v334_v8 = vld [vmem:[%s1532_s24] sm:$0xff]  ;;  %v335_v9 = vld [vmem:[%s1532_s24 + $0x8] sm:$0xff]  ;;  %v336_v10 = vld [vmem:[%s1532_s24 + $0x10] sm:$0xff]  ;;  %1189 = vmatprep.mubr.msk.f32.mxu1 %vm648_vm2, %v592_v60  ;;  %s1345_s17 = scalar_lea.vmem %s1731_s30, 16  ;;  %p1352_p0 = scmp.lt.s32.totalorder %s1731_s30, %s1350_s23 }
  0x1d   : > { %v1223_v11 = vpack.c.bf16 %v335_v9, %v334_v8  ;;  %v337_v12 = vld [vmem:[%s1532_s24 + $0x18] sm:$0xff]  ;;  %v338_v16 = vld [vmem:[%s1532_s24 + $0x20] sm:$0xff]  ;;  %v339_v17 = vld [vmem:[%s1532_s24 + $0x28] sm:$0xff]  ;;  %p1346_p11 = scmp.ne.s32.totalorder %s1731_s30, %s1345_s17  ;;  %p1353_p1 = scmp.lt.s32.totalorder %s1351_s25, %s1345_s17 }
  0x1e   : > { %v1229_v13 = vpack.c.bf16 %v337_v12, %v336_v10  ;;  %v1235_v20 = vpack.c.bf16 %v339_v17, %v338_v16  ;;  %398 = vperm.xlu0 %1343, %v364_v18   ;;  %v340_v23 = vld [vmem:[%s1532_s24 + $0x30] sm:$0xff]  ;;  %v341_v24 = vld [vmem:[%s1532_s24 + $0x38] sm:$0xff]  ;;  %v342_v30 = vld [vmem:[%s1532_s24 + $0x40] sm:$0xff] }
  0x1f   : > { %1225 = vmatprep.subr.msk.bf16.mxu0 %vm1536_vm1, %v1223_v11  ;;  %403 = vperm.xlu1 %1344, %v365_v19   ;;  %v1241_v27 = vpack.c.bf16 %v341_v24, %v340_v23  ;;  %v343_v31 = vld [vmem:[%s1532_s24 + $0x48] sm:$0xff]  ;;  %v344_v37 = vld [vmem:[%s1532_s24 + $0x50] sm:$0xff]  ;;  %v345_v38 = vld [vmem:[%s1532_s24 + $0x58] sm:$0xff]  ;;  %p1347_p12 = pnand %p1346_p11, %p1499_p5  ;;  %p1354_p2 = por %p1353_p1, %p1352_p0 }
  0x20   : > { %1228 = vmatpush3.bf16.xpose.msk.msra.mxu0 %vm1536_vm1, %v1223_v11  ;;  %v1247_v34 = vpack.c.bf16 %v343_v31, %v342_v30  ;;  %v1253_v41 = vpack.c.bf16 %v345_v38, %v344_v37  ;;  %v346_v44 = vld [vmem:[%s1532_s24 + $0x60] sm:$0xff]  ;;  %v347_v45 = vld [vmem:[%s1532_s24 + $0x68] sm:$0xff]  ;;  %v348_v50 = vld [vmem:[%s1532_s24 + $0x70] sm:$0xff] }
  0x21   : > { %1231 = vmatprep.subr.msk.bf16.mxu0 %vm1536_vm1, %v1229_v13  ;;  %v1259_v48 = vpack.c.bf16 %v347_v45, %v346_v44  ;;  %v349_v51 = vld [vmem:[%s1532_s24 + $0x78] sm:$0xff]  ;;  %v597_v37 = vld [vmem:[%s1774_s3 + $0x28] sm:$0xff]  ;;  %v598_v38 = vld [vmem:[%s1774_s3 + $0x30] sm:$0xff]  ;;  %s1729_s24 = scalar_lea.hbm %s1780_s9, %s1509_s22  ;;  %p1348_p13 = pneg %p1347_p12 }
  0x22   : > { %610 = vperm.xlu0 %1343, %v600_v21   ;;  %v1265_v52 = vpack.c.bf16 %v349_v51, %v348_v50 }
  0x23   : > { %615 = vperm.xlu1 %1344, %v601_v22   ;;  %p1355_p3 = pnand %p1354_p2, %p1348_p13 }
  0x26   : > { %620 = vperm.xlu0 %1343, %v602_v25  }
  0x27   : > { %625 = vperm.xlu1 %1344, %v603_v26  }
  0x28   : > { %1234 = vmatpush3.bf16.xpose.msk.msra.mxu0 %vm1536_vm1, %v1229_v13 }
  0x29   : > { %1237 = vmatprep.subr.msk.bf16.mxu0 %vm1536_vm1, %v1235_v20 }
  0x2a   : > { %630 = vperm.xlu0 %1343, %v604_v28  }
  0x2b   : > { %635 = vperm.xlu1 %1344, %v605_v29  }
  0x2e   : > { %640 = vperm.xlu0 %1343, %v606_v32  }
  0x2f   : > { %645 = vperm.xlu1 %1344, %v607_v33   ;;  %v593_v33 = vld [vmem:[%s1774_s3 + $0x8] sm:$0xff] }
  0x30   : > { %1240 = vmatpush3.bf16.xpose.msk.msra.mxu0 %vm1536_vm1, %v1235_v20 }
  0x31   : > { %1243 = vmatprep.subr.msk.bf16.mxu0 %vm1536_vm1, %v1241_v27 }
  0x32   : > { %796 = vperm.xlu0 %1343, %v790_v35   ;;  %v595_v35 = vld [vmem:[%s1774_s3 + $0x18] sm:$0xff] }
  0x33   : > { %801 = vperm.xlu1 %1344, %v791_v36   ;;  %v596_v36 = vld [vmem:[%s1774_s3 + $0x20] sm:$0xff] }
  0x36   : > { %806 = vperm.xlu0 %1343, %v792_v39   ;;  %v599_v39 = vld [vmem:[%s1774_s3 + $0x38] sm:$0xff] }
  0x37   : > { %811 = vperm.xlu1 %1344, %v793_v40   ;;  %v786_v40 = vld [vmem:[%s1776_s5] sm:$0xff] }
  0x38   : > { %1246 = vmatpush3.bf16.xpose.msk.msra.mxu0 %vm1536_vm1, %v1241_v27 }
  0x39   : > { %1249 = vmatprep.subr.msk.bf16.mxu0 %vm1536_vm1, %v1247_v34 }
  0x3a   : > { %921 = vperm.xlu0 %1343, %v915_v42  }
  0x3b   : > { %926 = vperm.xlu1 %1344, %v916_v43  }
  0x3e   : > { %931 = vperm.xlu0 %1343, %v917_v46  }
  0x3f   : > { %936 = vperm.xlu1 %1344, %v918_v47  }
  0x40   : > { %1252 = vmatpush3.bf16.xpose.msk.msra.mxu0 %vm1536_vm1, %v1247_v34  ;;  %v594_v34 = vld [vmem:[%s1774_s3 + $0x10] sm:$0xff] }
  0x41   : > { %1255 = vmatprep.subr.msk.bf16.mxu0 %vm1536_vm1, %v1253_v41 }
  0x42   : > { %955 = vperm.xlu0 %1343, %v952_v49  }
  0x48   : > { %1258 = vmatpush3.bf16.xpose.msk.msra.mxu0 %vm1536_vm1, %v1253_v41 }
  0x49   : > { %1261 = vmatprep.subr.msk.bf16.mxu0 %vm1536_vm1, %v1259_v48 }
  0x50   : > { %1264 = vmatpush3.bf16.xpose.msk.msra.mxu0 %vm1536_vm1, %v1259_v48 }
  0x51   : > { %1267 = vmatprep.subr.msk.bf16.mxu0 %vm1536_vm1, %v1265_v52 }
  0x58   : > { %1270 = vmatpush3.bf16.xpose.msk.msra.mxu0 %vm1536_vm1, %v1265_v52 }
  0x5f   : > { %1162 = vmatmul.mubr.msk.f32.vlgmr.msra.gmra.mrb[0].mxu0 %vm406_vm0, %v351_v53 }
  0x60   : > { %1164 = vmatprep.mubr.msk.f32.mxu0 %vm406_vm0, %v352_v54 }
  0x63   : > { %1165 = vmatmul.mubr.msk.f32.gmra.mrb[2].mxu0 %vm406_vm0, %v353_v55 }
  0x64   : > { %1167 = vmatprep.mubr.msk.f32.mxu0 %vm406_vm0, %v354_v56 }
  0x67   : > { %1168 = vmatmul.mubr.msk.f32.gmra.mrb[4].mxu0 %vm406_vm0, %v355_v57 }
  0x68   : > { %1170 = vmatprep.mubr.msk.f32.mxu0 %vm406_vm0, %v356_v58 }
  0x6b   : > { %1171 = vmatmul.mubr.msk.f32.gmra.mrb[6].mxu0 %vm406_vm0, %v357_v59 }
  0x91   : > { %v369_v61 = vpop.permute.xlu0 %368 }
  0x92   : > { %v379_v62 = vpop.permute.xlu1 %378 }
  0x95   : > { %v374_v63 = vpop.permute.xlu0 %373 }
  0x96   : > { %v384_v0 = vpop.permute.xlu1 %383 }
  0x99   : > { %v389_v13 = vpop.permute.xlu0 %388 }
  0x9a   : > { %v394_v10 = vpop.permute.xlu1 %393 }
  0x9d   : > { %v399_v25 = vpop.permute.xlu0 %398 }
  0x9e   : > { %v404_v22 = vpop.permute.xlu1 %403 }
  0xa1   : > { %v611_v42 = vpop.permute.xlu0 %610 }
  0xa2   : > { %v616_v41 = vpop.permute.xlu1 %615 }
  0xa5   : > { %v621_v45 = vpop.permute.xlu0 %620 }
  0xa6   : > { %v626_v43 = vpop.permute.xlu1 %625 }
  0xa9   : > { %v631_v57 = vpop.permute.xlu0 %630 }
  0xaa   : > { %v636_v54 = vpop.permute.xlu1 %635 }
 0x132   : > { %v1163_v1 = vpop.f32.mrb[0].mxu0 }
 0x133   : > { %v551_v2 = vadd.f32 %v1163_v1, %v374_v63  ;;  %v545_v3 = vpop.f32.mrb[1].mxu0 }
 0x134   : > { %v546_v4 = vadd.f32 %v545_v3, %v369_v61 }
 0x135   : > { %v585_v5 = vmax.f32 %v551_v2, 0.0  ;;  %v646_v2 = vpop.permute.xlu1 %645 }
 0x136   : > { %v584_v6 = vmax.f32 %v546_v4, 0.0  ;;  %v1166_v7 = vpop.f32.mrb[2].mxu0 }
 0x137   : > { %v561_v8 = vadd.f32 %v1166_v7, %v384_v0  ;;  %v555_v9 = vpop.f32.mrb[3].mxu0 }
 0x138   : > { %v556_v11 = vadd.f32 %v555_v9, %v379_v62  ;;  %v1271_v12 = vpack.c.bf16 %v585_v5, %v584_v6  ;;  %v641_v5 = vpop.permute.xlu0 %640 }
 0x139   : > { %v587_v14 = vmax.f32 %v561_v8, 0.0 }
 0x13a   : > { %v586_v15 = vmax.f32 %v556_v11, 0.0  ;;  %v1169_v16 = vpop.f32.mrb[4].mxu0  ;;  %1272 = vmatprep.subr.bf16.mxu1 %v1271_v12 }
 0x13b   : > { %v571_v17 = vadd.f32 %v1169_v16, %v394_v10  ;;  %v565_v18 = vpop.f32.mrb[5].mxu0  ;;  %1274 = vmatpush3.bf16.msra.mxu1 %v1271_v12 }
 0x13c   : > { %v1275_v19 = vpack.c.bf16 %v587_v14, %v586_v15  ;;  %v566_v20 = vadd.f32 %v565_v18, %v389_v13  ;;  %v787_v13 = vld [vmem:[%s1776_s5 + $0x8] sm:$0xff]  ;;  %v788_v14 = vld [vmem:[%s1776_s5 + $0x10] sm:$0xff]  ;;  %v789_v15 = vld [vmem:[%s1776_s5 + $0x18] sm:$0xff]  ;;  %v797_v16 = vpop.permute.xlu0 %796 }
 0x13d   : > { %v589_v21 = vmax.f32 %v571_v17, 0.0  ;;  %v802_v17 = vpop.permute.xlu1 %801 }
 0x13e   : > { %v588_v23 = vmax.f32 %v566_v20, 0.0  ;;  %v1172_v24 = vpop.f32.mrb[6].mxu0  ;;  %1276 = vmatprep.subr.bf16.mxu1 %v1275_v19 }
 0x13f   : > { %v581_v26 = vadd.f32 %v1172_v24, %v404_v22  ;;  %v575_v27 = vpop.f32.mrb[7].mxu0  ;;  %1278 = vmatpush3.bf16.msra.mxu1 %v1275_v19 }
 0x140   : > { %v1279_v28 = vpack.c.bf16 %v589_v21, %v588_v23  ;;  %v576_v29 = vadd.f32 %v575_v27, %v399_v25  ;;  %v807_v18 = vpop.permute.xlu0 %806 }
 0x141   : > { %v591_v30 = vmax.f32 %v581_v26, 0.0  ;;  %v812_v19 = vpop.permute.xlu1 %811 }
 0x142   : > { %v590_v31 = vmax.f32 %v576_v29, 0.0  ;;  %1280 = vmatprep.subr.bf16.mxu1 %v1279_v28 }
 0x143   : > { %1282 = vmatpush3.bf16.msra.mxu1 %v1279_v28 }
 0x144   : > { %v1283_v32 = vpack.c.bf16 %v591_v30, %v590_v31  ;;  %v922_v24 = vpop.permute.xlu0 %921 }
 0x145   : > { %v927_v26 = vpop.permute.xlu1 %926 }
 0x146   : > { %1284 = vmatprep.subr.bf16.mxu1 %v1283_v32 }
 0x147   : > { %1286 = vmatpush3.bf16.msra.mxu1 %v1283_v32 }
 0x14a   : > { %1190 = vmatmul.mubr.msk.f32.vlgmr.msra.gmra.mrb[0].mxu1 %vm648_vm2, %v593_v33 }
 0x14b   : > { %1192 = vmatprep.mubr.msk.f32.mxu1 %vm648_vm2, %v594_v34 }
 0x14e   : > { %1193 = vmatmul.mubr.msk.f32.gmra.mrb[2].mxu1 %vm648_vm2, %v595_v35 }
 0x14f   : > { %1195 = vmatprep.mubr.msk.f32.mxu1 %vm648_vm2, %v596_v36 }
 0x152   : > { %1196 = vmatmul.mubr.msk.f32.gmra.mrb[4].mxu1 %vm648_vm2, %v597_v37  ;;  %v932_v37 = vpop.permute.xlu0 %931 }
 0x153   : > { %1198 = vmatprep.mubr.msk.f32.mxu1 %vm648_vm2, %v598_v38 }
 0x156   : > { %1199 = vmatmul.mubr.msk.f32.gmra.mrb[6].mxu1 %vm648_vm2, %v599_v39  ;;  %v937_v39 = vpop.permute.xlu1 %936 }
 0x157   : > { %1217 = vmatprep.mubr.msk.f32.mxu1 %vm648_vm2, %v786_v40 }
 0x21d   : > { %v1191_v44 = vpop.f32.mrb[0].mxu1 }
 0x21e   : > { %v745_v46 = vadd.f32 %v1191_v44, %v616_v41  ;;  %v739_v47 = vpop.f32.mrb[1].mxu1 }
 0x21f   : > { %v740_v48 = vadd.f32 %v739_v47, %v611_v42  ;;  %v958_v42 = vlaneseq }
 0x220   : > { %v779_v49 = vmax.f32 %v745_v46, 0.0 }
 0x221   : > { %v778_v50 = vmax.f32 %v740_v48, 0.0  ;;  %v1194_v51 = vpop.f32.mrb[2].mxu1 }
 0x222   : > { %v755_v52 = vadd.f32 %v1194_v51, %v626_v43  ;;  %v749_v53 = vpop.f32.mrb[3].mxu1 }
 0x223   : > { %v1287_v55 = vpack.c.bf16 %v779_v49, %v778_v50  ;;  %v750_v56 = vadd.f32 %v749_v53, %v621_v45  ;;  %v959_v45 = vshrl.u32 %v958_v42, 7  ;;  %v956_v50 = vpop.permute.xlu0 %955 }
 0x224   : > { %v781_v58 = vmax.f32 %v755_v52, 0.0 }
 0x225   : > { %v780_v59 = vmax.f32 %v750_v56, 0.0  ;;  %v1197_v60 = vpop.f32.mrb[4].mxu1  ;;  %1288 = vmatprep.subr.bf16.mxu1 %v1287_v55  ;;  %v960_v48 = vsub.s32 0, %v959_v45 }
 0x226   : > { %v765_v61 = vadd.f32 %v1197_v60, %v636_v54  ;;  %v759_v62 = vpop.f32.mrb[5].mxu1  ;;  %1290 = vmatpush3.bf16.msra.mxu1 %v1287_v55 }
 0x227   : > { %v1291_v63 = vpack.c.bf16 %v781_v58, %v780_v59  ;;  %v760_v0 = vadd.f32 %v759_v62, %v631_v57  ;;  %v961_v52 = vrot.slane %v956_v50, %v960_v48 }
 0x228   : > { %v783_v1 = vmax.f32 %v765_v61, 0.0 }
 0x229   : > { %v782_v3 = vmax.f32 %v760_v0, 0.0  ;;  %v1200_v4 = vpop.f32.mrb[6].mxu1  ;;  %1292 = vmatprep.subr.bf16.mxu1 %v1291_v63 }
 0x22a   : > { %v775_v6 = vadd.f32 %v1200_v4, %v646_v2  ;;  %v769_v7 = vpop.f32.mrb[7].mxu1  ;;  %1294 = vmatpush3.bf16.msra.mxu1 %v1291_v63 }
 0x22b   : > { %v1295_v8 = vpack.c.bf16 %v783_v1, %v782_v3  ;;  %v770_v9 = vadd.f32 %v769_v7, %v641_v5 }
 0x22c   : > { %v785_v10 = vmax.f32 %v775_v6, 0.0 }
 0x22d   : > { %v784_v11 = vmax.f32 %v770_v9, 0.0  ;;  %1296 = vmatprep.subr.bf16.mxu1 %v1295_v8 }
 0x22e   : > { %1298 = vmatpush3.bf16.msra.mxu1 %v1295_v8 }
 0x22f   : > { %v1299_v12 = vpack.c.bf16 %v785_v10, %v784_v11 }
 0x231   : > { %1300 = vmatprep.subr.bf16.mxu1 %v1299_v12 }
 0x232   : > { %1302 = vmatpush3.bf16.msra.mxu1 %v1299_v12 }
 0x235   : > { %1218 = vmatmul.mubr.msk.f32.vlgmr.msra.gmra.mrb[8].mxu1 %vm648_vm2, %v787_v13 }
 0x236   : > { %1220 = vmatprep.mubr.msk.f32.mxu1 %vm648_vm2, %v788_v14 }
 0x239   : > { %1221 = vmatmul.mubr.msk.f32.gmra.mrb[10].mxu1 %vm648_vm2, %v789_v15 }
 0x308   : > { %v1219_v20 = vpop.f32.mrb[8].mxu1 }
 0x309   : > { %v898_v21 = vadd.f32 %v1219_v20, %v802_v17  ;;  %v892_v22 = vpop.f32.mrb[9].mxu1 }
 0x30a   : > { %v893_v23 = vadd.f32 %v892_v22, %v797_v16 }
 0x30b   : > { %v912_v25 = vmax.f32 %v898_v21, 0.0 }
 0x30c   : > { %v911_v27 = vmax.f32 %v893_v23, 0.0  ;;  %v1222_v28 = vpop.f32.mrb[10].mxu1 }
 0x30d   : > { %v940_v29 = vmul.f32 %v927_v26, %v912_v25  ;;  %v908_v30 = vadd.f32 %v1222_v28, %v812_v19  ;;  %v902_v31 = vpop.f32.mrb[11].mxu1 }
 0x30e   : > { %v939_v32 = vmul.f32 %v922_v24, %v911_v27  ;;  %v903_v33 = vadd.f32 %v902_v31, %v807_v18 }
 0x30f   : > { %v914_v35 = vmax.f32 %v908_v30, 0.0 }
 0x310   : > { %v943_v34 = vadd.f32 %v940_v29, %v939_v32  ;;  %v913_v36 = vmax.f32 %v903_v33, 0.0 }
 0x311   : > { %v942_v40 = vmul.f32 %v937_v39, %v914_v35 }
 0x312   : > { %v941_v38 = vmul.f32 %v932_v37, %v913_v36 }
 0x314   : > { %v944_v41 = vadd.f32 %v943_v34, %v941_v38 }
 0x316   : > { %v945_v43 = vadd.f32 %v944_v41, %v942_v40 }
 0x318   : > { %v946_v44 = vrot.slane %v945_v43, 4 }
 0x31a   : > { %v947_v46 = vadd.f32 %v946_v44, %v945_v43 }
 0x31c   : > { %v948_v47 = vrot.slane %v947_v46, 2 }
 0x31e   : > { %v949_v49 = vadd.f32 %v948_v47, %v947_v46 }
 0x320   : > { %v950_v51 = vrot.slane %v949_v49, 1 }
 0x322   : > { %v951_v53 = vadd.f32 %v950_v51, %v949_v49 }
 0x324   : > { %v962_v54 = vadd.f32 %v961_v52, %v951_v53 }
 0x326   : > { %963 = vst [vmem:[%s327_s29] sm:$0x1] %v962_v54 }
 0x327   : > { %1358 = shalt.err (!%p1355_p3)
}
 0x328   : > { %s1359_s22 = scalar_lea.hbm %s1729_s24, 16  ;;  %s1363_s28 = scalar_lea.hbm %s1780_s9, 32 }
 0x329   : > { %p1360_p4 = scmp.ne.s32.totalorder %s1729_s24, %s1359_s22  ;;  %p1364_p9 = scmp.lt.u32.totalorder %s1729_s24, %s1780_s9 }
 0x32a   : > { %p1365_p10 = scmp.lt.u32.totalorder %s1363_s28, %s1359_s22  ;;  %p1367_p12 = scmp.lt.u32.totalorder %s1359_s22, %s1729_s24 }
 0x32b   : > { %p1361_p7 = pnand %p1360_p4, %p1499_p5 }
 0x32c   : > { %p1366_p11 = por %p1365_p10, %p1364_p9 }
 0x32d   : > { %p1362_p8 = pneg %p1361_p7 }
 0x32e   : > { %p1368_p13 = por %p1367_p12, %p1366_p11 }
 0x330   : > { %p1369_p0 = pnand %p1368_p13, %p1362_p8 }
 0x332   : > { %1372 = shalt.err (!%p1369_p0)
}
 0x333   : > { %1303 = dma.vmem_to_hbm [thread:$0]  (%p1499_p5), %s1731_s30, 16, %s1729_s24, %s965_s15  }
 0x334 PF: > { %p1309_p1 = scmp.ge.s32.totalorder %s1407_s14, 2  ;;  %s989_s8 = sand.u32 1, %s1395_s11  }
 0x335   : > { %s990_s17 = scalar_lea.sflag [#allocation4], %s989_s8 }
 0x336   : > { %p1306_p2 = pnand %p1309_p1, %p1503_p6 }
 0x338   : > { %1390 = dma.done.wait (!%p1306_p2), %s990_s17, 16  }
 0x339   : > { %1392 = vsyncadd (!%p1306_p2), %s990_s17, 4294967280  ;;  %p21_p3 = scmp.ge.s32.totalorder %s1487_s16, 4   ;;  %s1785_s11 = smov %s1399_s12 }
 0x33a   : > { %s1786_s12 = smov %s1403_s13  ;;  %s1787_s13 = smov %s1497_s19 }
 0x33b   : > { %s1788_s14 = smov %s1487_s16  ;;  %23 = sbr.rel (!%p21_p3) target bundleno = 6 (0x6), region = 91 }
 0x342   :  { %994 = vsyncpa [#allocation4], 1 }
 0x343   :  { %996 = vsyncpa [#allocation4 + $0x1], 1 }

</bundles_post_ra>
